<compile_context>
chip_gen: v6e
topology: v6e:2x2x1
jax: 0.10.0
libtpu: 0.0.40
codegen_flags: <defaults>
</compile_context>

<pallas_src>
import jax
import jax.numpy as jnp
from jax.experimental import pallas as pl
from jax.experimental.pallas import tpu as pltpu

_MAX_TILE_B = 4096  # rows of x per grid step (multiple of 512)


def _round_up(n, m):
    return ((n + m - 1) // m) * m


def _mlp_hardtanh_kernel(x_ref, w1_ref, b1_ref, w2_ref, b2_ref,
                         w3t_ref, b3_ref, o_ref):
    # Cast the streamed (native-dtype) x tile to bf16 in-kernel; the few VPU
    # cast ops are hidden under the MXU stream.
    xb = x_ref[...].astype(jnp.bfloat16)

    # Layer 1: Linear + ReLU  (bf16 MXU matmul, f32 accumulation).
    h1 = jnp.dot(xb, w1_ref[...], preferred_element_type=jnp.float32)
    h1 = jnp.maximum(h1 + b1_ref[...], 0.0)

    # Layer 2: Linear + ReLU.
    h2 = jnp.dot(h1.astype(jnp.bfloat16), w2_ref[...],
                 preferred_element_type=jnp.float32)
    h2 = jnp.maximum(h2 + b2_ref[...], 0.0)

    # Output layer (out_dim == 1): VPU multiply by the broadcast w3 row + XLU
    # lane reduction instead of an N=1 MXU matmul (same vmatmul push cost as a
    # full-width matmul would be wasted for 0.5% of the FLOPs).
    y = jnp.sum(h2 * w3t_ref[...], axis=-1, keepdims=True) + b3_ref[...]

    # hardtanh(min_val=0.0, max_val=1.0) == clamp to [0, 1].
    o_ref[...] = jnp.clip(y, 0.0, 1.0).astype(o_ref.dtype)


def pubg_simple_regressor(x, params, *, max_tile_b=_MAX_TILE_B):
    """MLP + hardtanh forward as a batch-tiled Pallas kernel.

    x: (B, in_dim) float array (streamed in its native dtype).
    params: dict with w1 (in,H), b1 (1,H), w2 (H,H), b2 (1,H),
            w3 (H,1), b3 (1,1).   (PyTorch Linear weights must be transposed
            to (in, out) layout before building this dict.)
    Returns (B, 1) float32.
    """
    B, in_dim = x.shape
    hidden = params["w1"].shape[1]
    out_dim = params["w3"].shape[1]
    assert out_dim == 1, "VPU-reduce output path assumes a single regression target"

    # Weights: bf16 for the MXU matmuls; biases and the w3 row stay f32 (the
    # output projection runs on the f32 VPU/XLU path).  These are tiny and
    # VMEM-resident, so the one-time cast cost is negligible.
    w1 = params["w1"].astype(jnp.bfloat16)
    w2 = params["w2"].astype(jnp.bfloat16)
    b1 = params["b1"].astype(jnp.float32).reshape(1, hidden)
    b2 = params["b2"].astype(jnp.float32).reshape(1, hidden)
    w3t = params["w3"].astype(jnp.float32).reshape(hidden, 1).T   # (1, hidden)
    b3 = params["b3"].astype(jnp.float32).reshape(1, out_dim)

    # Batch tile selection:
    #  * small B: one tile, rounded to the 8-sublane granule (x stays f32).
    #  * large B: multiple-of-512 tiles, >= 2 tiles (two v7x TensorCores),
    #    capped at max_tile_b so the per-step footprint (~3.5 KiB/row) stays
    #    well inside the raised 48 MiB scoped-VMEM limit on every generation.
    if B <= 1024:
        tile_b = _round_up(B, 8)
    else:
        tile_b = min(max_tile_b, _round_up((B + 1) // 2, 512))
    n_tiles = pl.cdiv(B, tile_b)

    # Weights/biases: full-shape blocks, constant index_map -> VMEM-resident.
    resident = lambda a: pl.BlockSpec(a.shape, lambda i: (0,) * a.ndim)

    flops = 2 * B * (in_dim * hidden + hidden * hidden + hidden * out_dim)
    bytes_accessed = (x.size * x.dtype.itemsize
                      + (w1.size + w2.size) * 2
                      + (b1.size + b2.size + w3t.size + b3.size) * 4
                      + B * out_dim * 4)

    out = pl.pallas_call(
        _mlp_hardtanh_kernel,
        out_shape=jax.ShapeDtypeStruct((B, out_dim), jnp.float32),
        grid=(n_tiles,),
        in_specs=[
            pl.BlockSpec((tile_b, in_dim), lambda i: (i, 0)),  # x: streamed
            resident(w1), resident(b1),
            resident(w2), resident(b2),
            resident(w3t), resident(b3),
        ],
        out_specs=pl.BlockSpec((tile_b, out_dim), lambda i: (i, 0)),
        compiler_params=pltpu.CompilerParams(
            dimension_semantics=("parallel",),
            vmem_limit_bytes=48 * 1024 * 1024),
        cost_estimate=pl.CostEstimate(flops=flops, transcendentals=0,
                                      bytes_accessed=bytes_accessed),
    )(x, w1, b1, w2, b2, w3t, b3)

    return out


def init_params(key, in_dim, hidden, out_dim):
    ks = jax.random.split(key, 6)
    scale1 = 1.0 / jnp.sqrt(in_dim)
    scale2 = 1.0 / jnp.sqrt(hidden)
    return {
        "w1": jax.random.uniform(ks[0], (in_dim, hidden), jnp.float32,
                                 -scale1, scale1),
        "b1": jax.random.uniform(ks[1], (1, hidden), jnp.float32,
                                 -scale1, scale1),
        "w2": jax.random.uniform(ks[2], (hidden, hidden), jnp.float32,
                                 -scale2, scale2),
        "b2": jax.random.uniform(ks[3], (1, hidden), jnp.float32,
                                 -scale2, scale2),
        "w3": jax.random.uniform(ks[4], (hidden, out_dim), jnp.float32,
                                 -scale2, scale2),
        "b3": jax.random.uniform(ks[5], (1, out_dim), jnp.float32,
                                 -scale2, scale2),
    }


if __name__ == "__main__":
    key = jax.random.PRNGKey(0)
    k_x, k_x2, k_p = jax.random.split(key, 3)

    in_dim, hidden, out_dim = 32, 64, 1
    params = init_params(k_p, in_dim, hidden, out_dim)

    def reference_bf16(x, p):
        # Same dtype pipeline as the kernel (bf16 MXU matmuls, f32 elsewhere).
        xb = x.astype(jnp.bfloat16)
        h1 = jnp.maximum(
            jnp.dot(xb, p["w1"].astype(jnp.bfloat16),
                    preferred_element_type=jnp.float32) + p["b1"], 0.0)
        h2 = jnp.maximum(
            jnp.dot(h1.astype(jnp.bfloat16), p["w2"].astype(jnp.bfloat16),
                    preferred_element_type=jnp.float32) + p["b2"], 0.0)
        return jnp.clip(jnp.dot(h2, p["w3"]) + p["b3"], 0.0, 1.0)

    def reference_f32(x, p):
        h1 = jnp.maximum(x @ p["w1"] + p["b1"], 0.0)
        h2 = jnp.maximum(h1 @ p["w2"] + p["b2"], 0.0)
        return jnp.clip(h2 @ p["w3"] + p["b3"], 0.0, 1.0)

    # Small exact-fit batch.
    x = jax.random.normal(k_x, (8, in_dim), dtype=jnp.float32)
    out = jax.block_until_ready(pubg_simple_regressor(x, params))
    assert out.shape == (8, out_dim)
    assert jnp.allclose(out, reference_bf16(x, params), atol=1e-2, rtol=1e-2), \
        "mismatch vs bf16-pipeline reference"
    assert jnp.allclose(out, reference_f32(x, params), atol=5e-2, rtol=5e-2), \
        "mismatch vs f32 reference"

    # Ragged batch (B not a multiple of the tile) exercising the masked tail.
    x2 = jax.random.normal(k_x2, (20, in_dim), dtype=jnp.float32)
    out2 = jax.block_until_ready(pubg_simple_regressor(x2, params))
    assert out2.shape == (20, out_dim)
    assert jnp.allclose(out2, reference_bf16(x2, params), atol=1e-2, rtol=1e-2), \
        "mismatch vs bf16-pipeline reference (ragged batch)"

    print("KERNEL_OK")
</pallas_src>

<mosaic_0001>
module attributes {stable_mosaic.version = 11 : i64} {
  func.func @_mlp_hardtanh_kernel(%arg0: i32, %arg1: memref<8x32xf32, #tpu.memory_space<vmem>>, %arg2: memref<32x64xbf16, #tpu.memory_space<vmem>>, %arg3: memref<1x64xf32, #tpu.memory_space<vmem>>, %arg4: memref<64x64xbf16, #tpu.memory_space<vmem>>, %arg5: memref<1x64xf32, #tpu.memory_space<vmem>>, %arg6: memref<1x64xf32, #tpu.memory_space<vmem>>, %arg7: memref<1x1xf32, #tpu.memory_space<vmem>>, %arg8: memref<8x1xf32, #tpu.memory_space<vmem>>) attributes {dimension_semantics = [#tpu.dimension_semantics<parallel>], iteration_bounds = array<i64: 1>, scalar_prefetch = 0 : i64, scratch_operands = 0 : i64, tpu.core_type = #tpu.core_type<tc>, window_params = [{transform_indices = @transform_0, window_bounds = array<i64: 8, 32>}, {pipeline_mode = #tpu.pipeline_mode<synchronous>, transform_indices = @transform_1, window_bounds = array<i64: 32, 64>}, {pipeline_mode = #tpu.pipeline_mode<synchronous>, transform_indices = @transform_2, window_bounds = array<i64: 1, 64>}, {pipeline_mode = #tpu.pipeline_mode<synchronous>, transform_indices = @transform_3, window_bounds = array<i64: 64, 64>}, {pipeline_mode = #tpu.pipeline_mode<synchronous>, transform_indices = @transform_4, window_bounds = array<i64: 1, 64>}, {pipeline_mode = #tpu.pipeline_mode<synchronous>, transform_indices = @transform_5, window_bounds = array<i64: 1, 64>}, {pipeline_mode = #tpu.pipeline_mode<synchronous>, transform_indices = @transform_6, window_bounds = array<i64: 1, 1>}, {transform_indices = @transform_7, window_bounds = array<i64: 8, 1>}]} {
    %c0 = arith.constant 0 : index
    %c0_0 = arith.constant 0 : index
    %0 = vector.load %arg1[%c0, %c0_0] : memref<8x32xf32, #tpu.memory_space<vmem>>, vector<8x32xf32>
    %1 = arith.truncf %0 : vector<8x32xf32> to vector<8x32xbf16>
    %c0_1 = arith.constant 0 : index
    %c0_2 = arith.constant 0 : index
    %2 = vector.load %arg2[%c0_1, %c0_2] : memref<32x64xbf16, #tpu.memory_space<vmem>>, vector<32x64xbf16>
    %cst = arith.constant dense<0.000000e+00> : vector<8x64xf32>
    %3 = tpu.matmul %1, %2, %cst {dimension_numbers = #tpu.dot_dimension_numbers<[1], [0], [0], [1], [0, 0, 1, 1], [], []>} : vector<8x32xbf16>, vector<32x64xbf16>, vector<8x64xf32> -> vector<8x64xf32>
    %c0_3 = arith.constant 0 : index
    %c0_4 = arith.constant 0 : index
    %4 = vector.load %arg3[%c0_3, %c0_4] : memref<1x64xf32, #tpu.memory_space<vmem>>, vector<1x64xf32>
    %5 = vector.broadcast %4 : vector<1x64xf32> to vector<8x64xf32>
    %6 = arith.addf %3, %5 : vector<8x64xf32>
    %cst_5 = arith.constant 0.000000e+00 : f32
    %7 = vector.broadcast %cst_5 : f32 to vector<8x64xf32>
    %8 = arith.maximumf %6, %7 : vector<8x64xf32>
    %9 = arith.truncf %8 : vector<8x64xf32> to vector<8x64xbf16>
    %c0_6 = arith.constant 0 : index
    %c0_7 = arith.constant 0 : index
    %10 = vector.load %arg4[%c0_6, %c0_7] : memref<64x64xbf16, #tpu.memory_space<vmem>>, vector<64x64xbf16>
    %cst_8 = arith.constant dense<0.000000e+00> : vector<8x64xf32>
    %11 = tpu.matmul %9, %10, %cst_8 {dimension_numbers = #tpu.dot_dimension_numbers<[1], [0], [0], [1], [0, 0, 1, 1], [], []>} : vector<8x64xbf16>, vector<64x64xbf16>, vector<8x64xf32> -> vector<8x64xf32>
    %c0_9 = arith.constant 0 : index
    %c0_10 = arith.constant 0 : index
    %12 = vector.load %arg5[%c0_9, %c0_10] : memref<1x64xf32, #tpu.memory_space<vmem>>, vector<1x64xf32>
    %13 = vector.broadcast %12 : vector<1x64xf32> to vector<8x64xf32>
    %14 = arith.addf %11, %13 : vector<8x64xf32>
    %cst_11 = arith.constant 0.000000e+00 : f32
    %15 = vector.broadcast %cst_11 : f32 to vector<8x64xf32>
    %16 = arith.maximumf %14, %15 : vector<8x64xf32>
    %c0_12 = arith.constant 0 : index
    %c0_13 = arith.constant 0 : index
    %17 = vector.load %arg6[%c0_12, %c0_13] : memref<1x64xf32, #tpu.memory_space<vmem>>, vector<1x64xf32>
    %18 = vector.broadcast %17 : vector<1x64xf32> to vector<8x64xf32>
    %19 = arith.mulf %16, %18 : vector<8x64xf32>
    %cst_14 = arith.constant dense<0.000000e+00> : vector<8xf32>
    %20 = vector.multi_reduction <add>, %19, %cst_14 [1] : vector<8x64xf32> to vector<8xf32>
    %21 = vector.shape_cast %20 : vector<8xf32> to vector<8x1xf32>
    %c0_15 = arith.constant 0 : index
    %c0_16 = arith.constant 0 : index
    %22 = vector.load %arg7[%c0_15, %c0_16] : memref<1x1xf32, #tpu.memory_space<vmem>>, vector<1x1xf32>
    %23 = vector.broadcast %22 : vector<1x1xf32> to vector<8x1xf32>
    %24 = arith.addf %21, %23 : vector<8x1xf32>
    %cst_17 = arith.constant 0.000000e+00 : f32
    %cst_18 = arith.constant 1.000000e+00 : f32
    %25 = vector.broadcast %cst_17 : f32 to vector<8x1xf32>
    %26 = arith.maximumf %25, %24 : vector<8x1xf32>
    %27 = vector.broadcast %cst_18 : f32 to vector<8x1xf32>
    %28 = arith.minimumf %27, %26 : vector<8x1xf32>
    %c0_19 = arith.constant 0 : index
    %c0_20 = arith.constant 0 : index
    %29 = vector.load %arg8[%c0_19, %c0_20] : memref<8x1xf32, #tpu.memory_space<vmem>>, vector<8x1xf32>
    tpu.vector_store %arg8[%c0_19, %c0_20], %28 {strides = array<i32>} : memref<8x1xf32, #tpu.memory_space<vmem>>, vector<8x1xf32>,
    return
  }
  func.func @transform_0(%arg0: i32) -> (i32, i32) {
    %c0_i32 = arith.constant 0 : i32
    %c0_i32_0 = arith.constant 0 : i32
    return %arg0, %c0_i32 : i32, i32
  }
  func.func @transform_1(%arg0: i32) -> (i32, i32) {
    %c0_i32 = arith.constant 0 : i32
    %c0_i32_0 = arith.constant 0 : i32
    %c0_i32_1 = arith.constant 0 : i32
    return %c0_i32, %c0_i32_0 : i32, i32
  }
  func.func @transform_2(%arg0: i32) -> (i32, i32) {
    %c0_i32 = arith.constant 0 : i32
    %c0_i32_0 = arith.constant 0 : i32
    %c0_i32_1 = arith.constant 0 : i32
    return %c0_i32, %c0_i32_0 : i32, i32
  }
  func.func @transform_3(%arg0: i32) -> (i32, i32) {
    %c0_i32 = arith.constant 0 : i32
    %c0_i32_0 = arith.constant 0 : i32
    %c0_i32_1 = arith.constant 0 : i32
    return %c0_i32, %c0_i32_0 : i32, i32
  }
  func.func @transform_4(%arg0: i32) -> (i32, i32) {
    %c0_i32 = arith.constant 0 : i32
    %c0_i32_0 = arith.constant 0 : i32
    %c0_i32_1 = arith.constant 0 : i32
    return %c0_i32, %c0_i32_0 : i32, i32
  }
  func.func @transform_5(%arg0: i32) -> (i32, i32) {
    %c0_i32 = arith.constant 0 : i32
    %c0_i32_0 = arith.constant 0 : i32
    %c0_i32_1 = arith.constant 0 : i32
    return %c0_i32, %c0_i32_0 : i32, i32
  }
  func.func @transform_6(%arg0: i32) -> (i32, i32) {
    %c0_i32 = arith.constant 0 : i32
    %c0_i32_0 = arith.constant 0 : i32
    %c0_i32_1 = arith.constant 0 : i32
    return %c0_i32, %c0_i32_0 : i32, i32
  }
  func.func @transform_7(%arg0: i32) -> (i32, i32) {
    %c0_i32 = arith.constant 0 : i32
    %c0_i32_0 = arith.constant 0 : i32
    return %arg0, %c0_i32 : i32, i32
  }
}

</mosaic_0001>

<bundles_post_ra>
// kernel: tpu_custom_call.1
= control target key start
LH: loop header
LB: loop body
LE: loop exit
PB: predicated region body
PF: predicated region fallthrough
CT: control target
= control target key end

     0   :  { %s440_s0 = inlined_call_operand.hbm [shape: f32[8,32], index: 0, kind: input, shape index: {}]   ;;  %s441_s1 = inlined_call_operand.hbm [shape: bf16[32,64], index: 1, kind: input, shape index: {}]   ;;  %s442_s2 = inlined_call_operand.vmem [shape: f32[1,64], index: 2, kind: input, shape index: {}]   ;;  %s443_s3 = inlined_call_operand.hbm [shape: bf16[64,64], index: 3, kind: input, shape index: {}]   ;;  %s444_s4 = inlined_call_operand.vmem [shape: f32[1,64], index: 4, kind: input, shape index: {}]   ;;  %s445_s5 = inlined_call_operand.vmem [shape: f32[1,64], index: 5, kind: input, shape index: {}]   ;;  %s446_s6 = inlined_call_operand.<no memory space> [shape: f32[1,1], index: 6, kind: input, shape index: {}]   ;;  %s447_s7 = inlined_call_operand.vmem [shape: f32[8,1], index: 7, kind: output, shape index: {}]  }
   0x1   :  { %v12_v0 = vstv %s446_s6 }
   0x2   :  { %13 = vst [vmem:[#allocation2] sm:$0x1] %v12_v0 }
   0x3   :  { %14 = vsyncpa [#allocation4], 0 }
   0x4   :  { %15 = vsyncpa [#allocation6], 0  ;;  %s369_s26 = smov [#allocation5]  }
   0x5   :  { %s31_s27 = sshll.u32 %s369_s26, 4  ;;  %s32_s27 = int_to_ptr.vmem [resolvable:$true] %s31_s27 }
   0x6   :  { %s313_s28 = scalar_lea.vmem %s32_s27, 256  ;;  %p318_p1 = scmp.lt.s32.totalorder %s32_s27, %s32_s27 }
   0x7   :  { %p314_p0 = scmp.ne.s32.totalorder %s32_s27, %s313_s28  ;;  %p319_p2 = scmp.lt.s32.totalorder %s313_s28, %s313_s28 }
   0x9   :  { %p320_p3 = por %p319_p2, %p318_p1 }
   0xb   :  { %p321_p4 = pnand %p320_p3, %p314_p0 }
   0xd   :  { %324 = shalt.err (!%p321_p4)
}
   0xe   :  { %s370_s29 = smov 64   ;;  %s371_s30 = smov 4  }
   0xf   :  { %37 = dma.hbm_to_vmem [thread:$0]  %s441_s1, 256, %s32_s27, [#allocation6], %s370_s29, %s370_s29, %s371_s30  }
  0x10   :  { %s372_s6 = smov [#allocation3]   ;;  %s373_s11 = smov [#allocation7]  }
  0x11   :  { %s22_s10 = sshll.u32 %s372_s6, 4  ;;  %s45_s12 = sshll.u32 %s373_s11, 4  ;;  %s23_s10 = int_to_ptr.vmem [resolvable:$true] %s22_s10  ;;  %s46_s12 = int_to_ptr.vmem [resolvable:$true] %s45_s12 }
  0x12   :  { %s333_s13 = scalar_lea.vmem %s23_s10, 128  ;;  %p338_p6 = scmp.lt.s32.totalorder %s23_s10, %s23_s10 }
  0x13   :  { %p334_p5 = scmp.ne.s32.totalorder %s23_s10, %s333_s13  ;;  %p339_p7 = scmp.lt.s32.totalorder %s333_s13, %s333_s13 }
  0x15   :  { %p340_p8 = por %p339_p7, %p338_p6 }
  0x17   :  { %p341_p9 = pnand %p340_p8, %p334_p5 }
  0x19   :  { %344 = shalt.err (!%p341_p9)
}
  0x1a   :  { %25 = dma.hbm_to_vmem [thread:$0]  %s440_s0, 128, %s23_s10, [#allocation4]  }
  0x1b   :  { %s353_s16 = scalar_lea.vmem %s46_s12, 512  ;;  %p358_p11 = scmp.lt.s32.totalorder %s46_s12, %s46_s12 }
  0x1c   :  { %p354_p10 = scmp.ne.s32.totalorder %s46_s12, %s353_s16  ;;  %p359_p12 = scmp.lt.s32.totalorder %s353_s16, %s353_s16 }
  0x1e   :  { %p360_p13 = por %p359_p12, %p358_p11 }
  0x20   :  { %p361_p0 = pnand %p360_p13, %p354_p10 }
  0x22   :  { %364 = shalt.err (!%p361_p0)
}
  0x23   :  { %51 = dma.hbm_to_vmem [thread:$0]  %s443_s3, 512, %s46_s12, [#allocation6], %s370_s29, %s370_s29, %s371_s30  }
  0x24   :  { %365 = dma.done.wait [#allocation4], 128  }
  0x25   :  { %366 = vsyncadd [#allocation4], 4294967168 }
  0x26   :  { %367 = dma.done.wait [#allocation6], 768  }
  0x27   :  { %368 = vsyncadd [#allocation6], 4294966528  ;;  %v374_v1 = vmov 0.0   ;;  %vm375_vm0 = vmmov 0   ;;  %v299_v2 = vld [vmem:[#allocation5 + $0x8] sm:$0xff]   ;;  %v300_v3 = vld [vmem:[#allocation5] sm:$0xff]  }
  0x28   :  { %272 = vmatprep.subr.bf16.mxu0 %v374_v1  ;;  %276 = vmatprep.mubr.msk.bf16.mxu0 %vm375_vm0, %v374_v1  ;;  %v68_v4 = vld [vmem:[#allocation3] sm:$0xff]  ;;  %v301_v5 = vld [vmem:[#allocation7 + $0x18] sm:$0xff]   ;;  %v302_v6 = vld [vmem:[#allocation7 + $0x10] sm:$0xff]   ;;  %vm93_vm1 = vcmask 261120   ;;  %vm178_vm2 = vcmask 523264   ;;  %vm244_vm3 = vcmask 7168  }
  0x29   :  { %280 = vmatprep.subr.bf16.mxu1 %v374_v1  ;;  %288 = vmatprep.mubr.msk.bf16.mxu1 %vm375_vm0, %v374_v1  ;;  %v69_v7 = vpack.c.bf16 %v68_v4, %v68_v4  ;;  %v303_v8 = vld [vmem:[#allocation7 + $0x8] sm:$0xff]   ;;  %v304_v9 = vld [vmem:[#allocation7] sm:$0xff]  }
  0x2a   :  { %273 = vmatpush3.bf16.msra.mxu0 %v299_v2  ;;  %281 = vmatpush3.bf16.msra.mxu1 %v301_v5  ;;  %v252_v10 = vld [vmem:[%s442_s2] ss:$0 sm:$0xff] }
  0x2b   :  { %274 = vmatprep.subr.bf16.mxu0 %v374_v1  ;;  %282 = vmatprep.subr.bf16.mxu1 %v374_v1  ;;  %v256_v18 = vld [vmem:[%s444_s4] ss:$0 sm:$0xff] }
  0x2c   :  { %v262_v22 = vld [vmem:[%s445_s5] ss:$0 sm:$0xff] }
  0x2d   :  { %v263_v28 = vld [vmem:[#allocation2] ss:$0 sm:$0xff] }
  0x2e   :  { %275 = vmatpush3.bf16.msra.mxu0 %v300_v3  ;;  %283 = vmatpush3.bf16.msra.mxu1 %v302_v6 }
  0x2f   :  { %284 = vmatprep.subr.bf16.mxu1 %v374_v1 }
  0x31   :  { %277 = vmatmul.mubr.msk.bf16.vlgmr.msra.gmra.mxu0 %vm93_vm1, %v69_v7 }
  0x32   :  { %285 = vmatpush3.bf16.msra.mxu1 %v303_v8 }
  0x33   :  { %286 = vmatprep.subr.bf16.mxu1 %v374_v1 }
  0x36   :  { %287 = vmatpush3.bf16.msra.mxu1 %v304_v9 }
  0xf1   :  { %v131_v11 = vpop.f32.mrf.mxu0 }
  0xf2   :  { %v132_v12 = vadd.f32 %v252_v10, %v131_v11 }
  0xf3   :  { %v278_v13 = vpop.f32.mrf.mxu0 }
  0xf4   :  { %v137_v14 = vmax.f32 %v132_v12, 0.0 }
  0xf5   :  { %v134_v15 = vpop.f32.mrf.mxu0 }
  0xf6   :  { %v138_v16 = vpack.c.bf16 %v137_v14, %v137_v14 }
  0xf7   :  { %v279_v17 = vpop.f32.mrf.mxu0 }
  0xf8   :  { %289 = vmatmul.mubr.msk.bf16.vlgmr.msra.gmra.mxu1 %vm178_vm2, %v138_v16 }
 0x1b8   :  { %v216_v19 = vpop.f32.mrf.mxu1 }
 0x1b9   :  { %v217_v20 = vadd.f32 %v256_v18, %v216_v19 }
 0x1ba   :  { %v290_v21 = vpop.f32.mrf.mxu1 }
 0x1bb   :  { %v222_v23 = vmax.f32 %v217_v20, 0.0 }
 0x1bc   :  { %v219_v24 = vpop.f32.mrf.mxu1 }
 0x1bd   :  { %v230_v25 = vmul.f32 %v262_v22, %v222_v23 }
 0x1be   :  { %v291_v26 = vpop.f32.mrf.mxu1 }
 0x1bf   :  { %v231_v27 = vsel %vm178_vm2, %v230_v25, 0.0 }
 0x1c0   :  { %232 = vadd.xlane.f32.xlu0 %v231_v27 }
 0x249   :  { %v233_v29 = vpop.xlane.xlu0 %232 }
 0x24a   :  { %v241_v30 = vadd.f32 %v263_v28, %v233_v29 }
 0x24c   :  { %v242_v31 = vmax.f32 %v241_v30, 0.0 }
 0x24e   :  { %v243_v32 = vmin.f32 %v242_v31, 1.0 }
 0x250   :  { %245 = vst.msk [vmem:[%s447_s7] sm:$0xff] %vm244_vm3, %v243_v32 }
 0x251   :  { %250 = vsyncpa [#allocation4], 1 }
 0x252   :  { %251 = vsyncpa [#allocation6], 1 }

</bundles_post_ra>
